<compile_context>
chip_gen: v7x
topology: tpu7x:2x2x1
jax: 0.10.0
libtpu: 0.0.40
codegen_flags: <defaults>
</compile_context>

<pallas_src>
import functools

import jax
import jax.numpy as jnp
from jax.experimental import pallas as pl
from jax.experimental.pallas import tpu as pltpu


# ----------------------------------------------------------------------------
# Fused Pallas kernel: conv chain + pooling + classifier for one batch item.
# ----------------------------------------------------------------------------
def _m13_fused_kernel(*refs, fe_shapes, n_cls, pooling):
    """Ref order (inputs, outputs, scratch):

      x_ref (T, C_in)                                       -- squeezed batch block
      [fe_w_i (K, C_in_i, C_out_i), fe_b_i (1, C_out_i)]    per conv block
      [cls_w_j (D_in_j, D_out_j), cls_b_j (1, D_out_j)]     per hidden cls block
      out_w (D, n_out), out_b (1, n_out)
      o_ref (1, 1, n_out)
      [scratch_i (T_out_i, C_out_i)]                        for conv blocks 0..n_fe-2
    """
    n_fe = len(fe_shapes)
    it = iter(refs)
    x_ref = next(it)
    fe_refs = [(next(it), next(it)) for _ in range(n_fe)]
    cls_refs = [(next(it), next(it)) for _ in range(n_cls)]
    out_w_ref = next(it)
    out_b_ref = next(it)
    o_ref = next(it)
    scratches = list(it)

    # ---- FeBlocks: valid conv1d (+ bias + ReLU) chain; windows read in VMEM ----
    cur_ref = x_ref
    y = None
    for li, (t_in, c_in, t_out, c_out, ksz, stride) in enumerate(fe_shapes):
        w_ref, b_ref = fe_refs[li]
        acc = None
        for k in range(ksz):  # static tap loop (fully unrolled at trace time)
            # strided window read straight off the VMEM ref: rows k, k+stride, ...
            xk = cur_ref[pl.ds(k, t_out, stride=stride), :]        # (t_out, c_in)
            wk = w_ref[k]                                          # (c_in, c_out)
            if c_in == 1:
                contrib = xk * wk                                  # VPU broadcast outer product
            else:
                contrib = jnp.dot(xk, wk,                          # MXU matmul
                                  preferred_element_type=jnp.float32)
            acc = contrib if acc is None else acc + contrib
        y = jnp.maximum(acc + b_ref[...], 0.0)                     # (t_out, c_out)
        if li < n_fe - 1:
            scratches[li][...] = y                                 # stays resident in VMEM
            cur_ref = scratches[li]

    # ---- pooling: reduce 'b c n -> b c' ----
    t_last = fe_shapes[-1][2]
    if pooling == "max":
        h = jnp.max(y, axis=0, keepdims=True)                      # (1, C_feat)
    else:
        h = jnp.sum(y, axis=0, keepdims=True) * (1.0 / float(t_last))

    # ---- Classifier head, fully fused; single small store of the logits ----
    for w_ref, b_ref in cls_refs:
        h = jnp.dot(h, w_ref[...], preferred_element_type=jnp.float32) + b_ref[...]
        h = jnp.maximum(h, 0.0)
    logits = jnp.dot(h, out_w_ref[...], preferred_element_type=jnp.float32) + out_b_ref[...]
    o_ref[0] = logits.astype(o_ref.dtype)                          # (1, n_out)


# ----------------------------------------------------------------------------
# Wrapper: one pallas_call for the whole forward pass.
# ----------------------------------------------------------------------------
def m13_forward(x_bct, params):
    """x_bct: (B, C_in, T) float32 -> logits (B, n_output)."""
    B, c0, t0 = x_bct.shape
    x = jnp.transpose(x_bct, (0, 2, 1)).astype(jnp.float32)        # (B, T, C_in)

    fe = params["fe"]
    cls_hidden = params["cls"]["hidden"]
    out_w = params["cls"]["out_w"]
    out_b = params["cls"]["out_b"]
    n_out = out_w.shape[-1]

    # Static per-conv-block geometry: (T_in, C_in, T_out, C_out, K, stride)
    fe_shapes = []
    ti, ci = t0, c0
    for blk in fe:
        ksz, w_cin, c_out = blk["w"].shape
        assert w_cin == ci, (w_cin, ci)
        s = int(blk["stride"])
        to = (ti - ksz) // s + 1
        fe_shapes.append((ti, ci, to, c_out, ksz, s))
        ti, ci = to, c_out
    n_fe = len(fe_shapes)
    n_cls = len(cls_hidden)

    inputs = [x]
    in_specs = [pl.BlockSpec((pl.Squeezed(), t0, c0), lambda b: (b, 0, 0))]
    for blk in fe:
        inputs += [blk["w"], blk["b"]]
        in_specs += [pl.BlockSpec(blk["w"].shape, lambda b: (0, 0, 0)),
                     pl.BlockSpec(blk["b"].shape, lambda b: (0, 0))]
    for blk in cls_hidden:
        inputs += [blk["w"], blk["b"]]
        in_specs += [pl.BlockSpec(blk["w"].shape, lambda b: (0, 0)),
                     pl.BlockSpec(blk["b"].shape, lambda b: (0, 0))]
    inputs += [out_w, out_b]
    in_specs += [pl.BlockSpec(out_w.shape, lambda b: (0, 0)),
                 pl.BlockSpec(out_b.shape, lambda b: (0, 0))]

    # Only intermediate conv activations need scratch (last one is consumed directly).
    scratch_shapes = [pltpu.VMEM((s[2], s[3]), jnp.float32) for s in fe_shapes[:-1]]

    # Advisory cost hint for XLA's scheduler.
    flops = 0
    for (_, ci_, to_, co_, k_, _) in fe_shapes:
        flops += 2 * to_ * co_ * ci_ * k_
    d = fe_shapes[-1][3]
    for blk in cls_hidden:
        flops += 2 * blk["w"].shape[0] * blk["w"].shape[1]
        d = blk["w"].shape[1]
    flops += 2 * d * n_out
    flops *= B
    bytes_accessed = 4 * (x.size + sum(int(a.size) for a in inputs[1:]) + B * n_out)

    kernel = functools.partial(
        _m13_fused_kernel,
        fe_shapes=tuple(fe_shapes),
        n_cls=n_cls,
        pooling=params.get("pooling", "mean"),
    )

    out = pl.pallas_call(
        kernel,
        grid=(B,),
        out_shape=jax.ShapeDtypeStruct((B, 1, n_out), jnp.float32),
        in_specs=in_specs,
        out_specs=pl.BlockSpec((1, 1, n_out), lambda b: (b, 0, 0)),
        scratch_shapes=scratch_shapes,
        compiler_params=pltpu.CompilerParams(dimension_semantics=("parallel",)),
        cost_estimate=pl.CostEstimate(flops=flops, transcendentals=0,
                                      bytes_accessed=bytes_accessed),
    )(*inputs)
    return out.reshape(B, n_out)


# ----------------------------------------------------------------------------
# Pure-JAX reference (same math, no Pallas) — correctness check only.
# ----------------------------------------------------------------------------
def m13_reference(x_bct, params):
    x = jnp.transpose(x_bct, (0, 2, 1)).astype(jnp.float32)        # (B, T, C_in)
    for blk in params["fe"]:
        ksz, c_in, c_out = blk["w"].shape
        s = int(blk["stride"])
        t_in = x.shape[1]
        t_out = (t_in - ksz) // s + 1
        acc = jnp.zeros((x.shape[0], t_out, c_out), jnp.float32)
        for k in range(ksz):
            xk = x[:, k:k + (t_out - 1) * s + 1:s, :]              # (B, t_out, c_in)
            acc = acc + jnp.einsum("btc,cd->btd", xk, blk["w"][k])
        x = jnp.maximum(acc + blk["b"][None], 0.0)
    if params.get("pooling", "mean") == "max":
        h = x.max(axis=1)
    else:
        h = x.mean(axis=1)
    for blk in params["cls"]["hidden"]:
        h = jnp.maximum(h @ blk["w"] + blk["b"], 0.0)
    return h @ params["cls"]["out_w"] + params["cls"]["out_b"]


# ----------------------------------------------------------------------------
# Deterministic parameter construction (weights stored pre-laid-out for the kernel).
# ----------------------------------------------------------------------------
def make_params(key, *, n_input, n_output, fe_n_block, fe_n_channel, fe_kernel,
                fe_stride, cls_n_block, cls_hidden, pooling="mean"):
    keys = iter(jax.random.split(key, 64))

    def init(shape, scale=0.1):
        return scale * jax.random.normal(next(keys), shape, jnp.float32)

    fe = []
    c_in = n_input
    for _ in range(fe_n_block):
        fe.append({
            "w": init((fe_kernel, c_in, fe_n_channel)),   # (K, C_in, C_out)
            "b": init((1, fe_n_channel)),
            "stride": fe_stride,
        })
        c_in = fe_n_channel

    hidden = []
    d_in = fe_n_channel                                   # n_feature after pooling
    for _ in range(cls_n_block):
        hidden.append({"w": init((d_in, cls_hidden)), "b": init((1, cls_hidden))})
        d_in = cls_hidden

    return {
        "fe": fe,
        "cls": {"hidden": hidden,
                "out_w": init((d_in, n_output)),
                "out_b": init((1, n_output))},
        "pooling": pooling,
    }


if __name__ == "__main__":
    key = jax.random.PRNGKey(0)
    k_x, k_p = jax.random.split(key)

    # small config: 1 input audio channel, T=128 samples, 4 output classes
    B, C_IN, T = 2, 1, 128
    N_OUT = 4
    params = make_params(
        k_p,
        n_input=C_IN, n_output=N_OUT,
        fe_n_block=2, fe_n_channel=8, fe_kernel=7, fe_stride=2,
        cls_n_block=1, cls_hidden=32,
        pooling="mean",
    )

    x = jax.random.normal(k_x, (B, C_IN, T), jnp.float32)

    forward = jax.jit(lambda xx: m13_forward(xx, params))
    logits = forward(x)
    jax.block_until_ready(logits)
    assert logits.shape == (B, N_OUT), logits.shape

    ref = m13_reference(x, params)
    max_err = float(jnp.max(jnp.abs(logits - ref)))
    assert max_err < 2e-3, f"max abs err vs reference: {max_err}"

    print("KERNEL_OK")
</pallas_src>

<mosaic_0001>
module attributes {stable_mosaic.version = 11 : i64} {
  func.func @_m13_fused_kernel(%arg0: i32, %arg1: memref<1x128x1xf32, #tpu.memory_space<vmem>>, %arg2: memref<7x1x8xf32, #tpu.memory_space<vmem>>, %arg3: memref<1x8xf32, #tpu.memory_space<vmem>>, %arg4: memref<7x8x8xf32, #tpu.memory_space<vmem>>, %arg5: memref<1x8xf32, #tpu.memory_space<vmem>>, %arg6: memref<8x32xf32, #tpu.memory_space<vmem>>, %arg7: memref<1x32xf32, #tpu.memory_space<vmem>>, %arg8: memref<32x4xf32, #tpu.memory_space<vmem>>, %arg9: memref<1x4xf32, #tpu.memory_space<vmem>>, %arg10: memref<1x1x4xf32, #tpu.memory_space<vmem>>, %arg11: memref<61x8xf32, #tpu.memory_space<vmem>>) attributes {dimension_semantics = [#tpu.dimension_semantics<parallel>], iteration_bounds = array<i64: 2>, scalar_prefetch = 0 : i64, scratch_operands = 1 : i64, tpu.core_type = #tpu.core_type<tc>, window_params = [{transform_indices = @transform_0, window_bounds = array<i64: 1, 128, 1>}, {pipeline_mode = #tpu.pipeline_mode<synchronous>, transform_indices = @transform_1, window_bounds = array<i64: 7, 1, 8>}, {pipeline_mode = #tpu.pipeline_mode<synchronous>, transform_indices = @transform_2, window_bounds = array<i64: 1, 8>}, {pipeline_mode = #tpu.pipeline_mode<synchronous>, transform_indices = @transform_3, window_bounds = array<i64: 7, 8, 8>}, {pipeline_mode = #tpu.pipeline_mode<synchronous>, transform_indices = @transform_4, window_bounds = array<i64: 1, 8>}, {pipeline_mode = #tpu.pipeline_mode<synchronous>, transform_indices = @transform_5, window_bounds = array<i64: 8, 32>}, {pipeline_mode = #tpu.pipeline_mode<synchronous>, transform_indices = @transform_6, window_bounds = array<i64: 1, 32>}, {pipeline_mode = #tpu.pipeline_mode<synchronous>, transform_indices = @transform_7, window_bounds = array<i64: 32, 4>}, {pipeline_mode = #tpu.pipeline_mode<synchronous>, transform_indices = @transform_8, window_bounds = array<i64: 1, 4>}, {transform_indices = @transform_9, window_bounds = array<i64: 1, 1, 4>}]} {
    %c0 = arith.constant 0 : index
    %c0_0 = arith.constant 0 : index
    %c0_1 = arith.constant 0 : index
    %0 = tpu.strided_load %arg1[%c0, %c0_0, %c0_1] {strides = array<i32: 1, 2, 1>} : memref<1x128x1xf32, #tpu.memory_space<vmem>>, vector<1x61x1xf32>
    %1 = vector.shape_cast %0 : vector<1x61x1xf32> to vector<61x1xf32>
    %c0_2 = arith.constant 0 : index
    %c0_3 = arith.constant 0 : index
    %c0_4 = arith.constant 0 : index
    %2 = vector.load %arg2[%c0_2, %c0_3, %c0_4] : memref<7x1x8xf32, #tpu.memory_space<vmem>>, vector<1x1x8xf32>
    %3 = vector.shape_cast %2 : vector<1x1x8xf32> to vector<1x8xf32>
    %4 = vector.broadcast %1 : vector<61x1xf32> to vector<61x8xf32>
    %5 = vector.broadcast %3 : vector<1x8xf32> to vector<61x8xf32>
    %6 = arith.mulf %4, %5 : vector<61x8xf32>
    %c0_5 = arith.constant 0 : index
    %c1 = arith.constant 1 : index
    %c0_6 = arith.constant 0 : index
    %7 = tpu.strided_load %arg1[%c0_5, %c1, %c0_6] {strides = array<i32: 1, 2, 1>} : memref<1x128x1xf32, #tpu.memory_space<vmem>>, vector<1x61x1xf32>
    %8 = vector.shape_cast %7 : vector<1x61x1xf32> to vector<61x1xf32>
    %c1_7 = arith.constant 1 : index
    %c0_8 = arith.constant 0 : index
    %c0_9 = arith.constant 0 : index
    %9 = vector.load %arg2[%c1_7, %c0_8, %c0_9] : memref<7x1x8xf32, #tpu.memory_space<vmem>>, vector<1x1x8xf32>
    %10 = vector.shape_cast %9 : vector<1x1x8xf32> to vector<1x8xf32>
    %11 = vector.broadcast %8 : vector<61x1xf32> to vector<61x8xf32>
    %12 = vector.broadcast %10 : vector<1x8xf32> to vector<61x8xf32>
    %13 = arith.mulf %11, %12 : vector<61x8xf32>
    %14 = arith.addf %6, %13 : vector<61x8xf32>
    %c0_10 = arith.constant 0 : index
    %c2 = arith.constant 2 : index
    %c0_11 = arith.constant 0 : index
    %15 = tpu.strided_load %arg1[%c0_10, %c2, %c0_11] {strides = array<i32: 1, 2, 1>} : memref<1x128x1xf32, #tpu.memory_space<vmem>>, vector<1x61x1xf32>
    %16 = vector.shape_cast %15 : vector<1x61x1xf32> to vector<61x1xf32>
    %c2_12 = arith.constant 2 : index
    %c0_13 = arith.constant 0 : index
    %c0_14 = arith.constant 0 : index
    %17 = vector.load %arg2[%c2_12, %c0_13, %c0_14] : memref<7x1x8xf32, #tpu.memory_space<vmem>>, vector<1x1x8xf32>
    %18 = vector.shape_cast %17 : vector<1x1x8xf32> to vector<1x8xf32>
    %19 = vector.broadcast %16 : vector<61x1xf32> to vector<61x8xf32>
    %20 = vector.broadcast %18 : vector<1x8xf32> to vector<61x8xf32>
    %21 = arith.mulf %19, %20 : vector<61x8xf32>
    %22 = arith.addf %14, %21 : vector<61x8xf32>
    %c0_15 = arith.constant 0 : index
    %c3 = arith.constant 3 : index
    %c0_16 = arith.constant 0 : index
    %23 = tpu.strided_load %arg1[%c0_15, %c3, %c0_16] {strides = array<i32: 1, 2, 1>} : memref<1x128x1xf32, #tpu.memory_space<vmem>>, vector<1x61x1xf32>
    %24 = vector.shape_cast %23 : vector<1x61x1xf32> to vector<61x1xf32>
    %c3_17 = arith.constant 3 : index
    %c0_18 = arith.constant 0 : index
    %c0_19 = arith.constant 0 : index
    %25 = vector.load %arg2[%c3_17, %c0_18, %c0_19] : memref<7x1x8xf32, #tpu.memory_space<vmem>>, vector<1x1x8xf32>
    %26 = vector.shape_cast %25 : vector<1x1x8xf32> to vector<1x8xf32>
    %27 = vector.broadcast %24 : vector<61x1xf32> to vector<61x8xf32>
    %28 = vector.broadcast %26 : vector<1x8xf32> to vector<61x8xf32>
    %29 = arith.mulf %27, %28 : vector<61x8xf32>
    %30 = arith.addf %22, %29 : vector<61x8xf32>
    %c0_20 = arith.constant 0 : index
    %c4 = arith.constant 4 : index
    %c0_21 = arith.constant 0 : index
    %31 = tpu.strided_load %arg1[%c0_20, %c4, %c0_21] {strides = array<i32: 1, 2, 1>} : memref<1x128x1xf32, #tpu.memory_space<vmem>>, vector<1x61x1xf32>
    %32 = vector.shape_cast %31 : vector<1x61x1xf32> to vector<61x1xf32>
    %c4_22 = arith.constant 4 : index
    %c0_23 = arith.constant 0 : index
    %c0_24 = arith.constant 0 : index
    %33 = vector.load %arg2[%c4_22, %c0_23, %c0_24] : memref<7x1x8xf32, #tpu.memory_space<vmem>>, vector<1x1x8xf32>
    %34 = vector.shape_cast %33 : vector<1x1x8xf32> to vector<1x8xf32>
    %35 = vector.broadcast %32 : vector<61x1xf32> to vector<61x8xf32>
    %36 = vector.broadcast %34 : vector<1x8xf32> to vector<61x8xf32>
    %37 = arith.mulf %35, %36 : vector<61x8xf32>
    %38 = arith.addf %30, %37 : vector<61x8xf32>
    %c0_25 = arith.constant 0 : index
    %c5 = arith.constant 5 : index
    %c0_26 = arith.constant 0 : index
    %39 = tpu.strided_load %arg1[%c0_25, %c5, %c0_26] {strides = array<i32: 1, 2, 1>} : memref<1x128x1xf32, #tpu.memory_space<vmem>>, vector<1x61x1xf32>
    %40 = vector.shape_cast %39 : vector<1x61x1xf32> to vector<61x1xf32>
    %c5_27 = arith.constant 5 : index
    %c0_28 = arith.constant 0 : index
    %c0_29 = arith.constant 0 : index
    %41 = vector.load %arg2[%c5_27, %c0_28, %c0_29] : memref<7x1x8xf32, #tpu.memory_space<vmem>>, vector<1x1x8xf32>
    %42 = vector.shape_cast %41 : vector<1x1x8xf32> to vector<1x8xf32>
    %43 = vector.broadcast %40 : vector<61x1xf32> to vector<61x8xf32>
    %44 = vector.broadcast %42 : vector<1x8xf32> to vector<61x8xf32>
    %45 = arith.mulf %43, %44 : vector<61x8xf32>
    %46 = arith.addf %38, %45 : vector<61x8xf32>
    %c0_30 = arith.constant 0 : index
    %c6 = arith.constant 6 : index
    %c0_31 = arith.constant 0 : index
    %47 = tpu.strided_load %arg1[%c0_30, %c6, %c0_31] {strides = array<i32: 1, 2, 1>} : memref<1x128x1xf32, #tpu.memory_space<vmem>>, vector<1x61x1xf32>
    %48 = vector.shape_cast %47 : vector<1x61x1xf32> to vector<61x1xf32>
    %c6_32 = arith.constant 6 : index
    %c0_33 = arith.constant 0 : index
    %c0_34 = arith.constant 0 : index
    %49 = vector.load %arg2[%c6_32, %c0_33, %c0_34] : memref<7x1x8xf32, #tpu.memory_space<vmem>>, vector<1x1x8xf32>
    %50 = vector.shape_cast %49 : vector<1x1x8xf32> to vector<1x8xf32>
    %51 = vector.broadcast %48 : vector<61x1xf32> to vector<61x8xf32>
    %52 = vector.broadcast %50 : vector<1x8xf32> to vector<61x8xf32>
    %53 = arith.mulf %51, %52 : vector<61x8xf32>
    %54 = arith.addf %46, %53 : vector<61x8xf32>
    %c0_35 = arith.constant 0 : index
    %c0_36 = arith.constant 0 : index
    %55 = vector.load %arg3[%c0_35, %c0_36] : memref<1x8xf32, #tpu.memory_space<vmem>>, vector<1x8xf32>
    %56 = vector.broadcast %55 : vector<1x8xf32> to vector<61x8xf32>
    %57 = arith.addf %54, %56 : vector<61x8xf32>
    %cst = arith.constant 0.000000e+00 : f32
    %58 = vector.broadcast %cst : f32 to vector<61x8xf32>
    %59 = arith.maximumf %57, %58 : vector<61x8xf32>
    %c0_37 = arith.constant 0 : index
    %c0_38 = arith.constant 0 : index
    %60 = vector.load %arg11[%c0_37, %c0_38] : memref<61x8xf32, #tpu.memory_space<vmem>>, vector<61x8xf32>
    tpu.vector_store %arg11[%c0_37, %c0_38], %59 {strides = array<i32>} : memref<61x8xf32, #tpu.memory_space<vmem>>, vector<61x8xf32>,
    %c0_39 = arith.constant 0 : index
    %c0_40 = arith.constant 0 : index
    %61 = tpu.strided_load %arg11[%c0_39, %c0_40] {strides = array<i32: 2, 1>} : memref<61x8xf32, #tpu.memory_space<vmem>>, vector<28x8xf32>
    %c0_41 = arith.constant 0 : index
    %c0_42 = arith.constant 0 : index
    %c0_43 = arith.constant 0 : index
    %62 = vector.load %arg4[%c0_41, %c0_42, %c0_43] : memref<7x8x8xf32, #tpu.memory_space<vmem>>, vector<1x8x8xf32>
    %63 = vector.shape_cast %62 : vector<1x8x8xf32> to vector<8x8xf32>
    %cst_44 = arith.constant dense<0.000000e+00> : vector<28x8xf32>
    %64 = tpu.matmul %61, %63, %cst_44 {dimension_numbers = #tpu.dot_dimension_numbers<[1], [0], [0], [1], [0, 0, 1, 1], [], []>} : vector<28x8xf32>, vector<8x8xf32>, vector<28x8xf32> -> vector<28x8xf32>
    %c1_45 = arith.constant 1 : index
    %c0_46 = arith.constant 0 : index
    %65 = tpu.strided_load %arg11[%c1_45, %c0_46] {strides = array<i32: 2, 1>} : memref<61x8xf32, #tpu.memory_space<vmem>>, vector<28x8xf32>
    %c1_47 = arith.constant 1 : index
    %c0_48 = arith.constant 0 : index
    %c0_49 = arith.constant 0 : index
    %66 = vector.load %arg4[%c1_47, %c0_48, %c0_49] : memref<7x8x8xf32, #tpu.memory_space<vmem>>, vector<1x8x8xf32>
    %67 = vector.shape_cast %66 : vector<1x8x8xf32> to vector<8x8xf32>
    %cst_50 = arith.constant dense<0.000000e+00> : vector<28x8xf32>
    %68 = tpu.matmul %65, %67, %cst_50 {dimension_numbers = #tpu.dot_dimension_numbers<[1], [0], [0], [1], [0, 0, 1, 1], [], []>} : vector<28x8xf32>, vector<8x8xf32>, vector<28x8xf32> -> vector<28x8xf32>
    %69 = arith.addf %64, %68 : vector<28x8xf32>
    %c2_51 = arith.constant 2 : index
    %c0_52 = arith.constant 0 : index
    %70 = tpu.strided_load %arg11[%c2_51, %c0_52] {strides = array<i32: 2, 1>} : memref<61x8xf32, #tpu.memory_space<vmem>>, vector<28x8xf32>
    %c2_53 = arith.constant 2 : index
    %c0_54 = arith.constant 0 : index
    %c0_55 = arith.constant 0 : index
    %71 = vector.load %arg4[%c2_53, %c0_54, %c0_55] : memref<7x8x8xf32, #tpu.memory_space<vmem>>, vector<1x8x8xf32>
    %72 = vector.shape_cast %71 : vector<1x8x8xf32> to vector<8x8xf32>
    %cst_56 = arith.constant dense<0.000000e+00> : vector<28x8xf32>
    %73 = tpu.matmul %70, %72, %cst_56 {dimension_numbers = #tpu.dot_dimension_numbers<[1], [0], [0], [1], [0, 0, 1, 1], [], []>} : vector<28x8xf32>, vector<8x8xf32>, vector<28x8xf32> -> vector<28x8xf32>
    %74 = arith.addf %69, %73 : vector<28x8xf32>
    %c3_57 = arith.constant 3 : index
    %c0_58 = arith.constant 0 : index
    %75 = tpu.strided_load %arg11[%c3_57, %c0_58] {strides = array<i32: 2, 1>} : memref<61x8xf32, #tpu.memory_space<vmem>>, vector<28x8xf32>
    %c3_59 = arith.constant 3 : index
    %c0_60 = arith.constant 0 : index
    %c0_61 = arith.constant 0 : index
    %76 = vector.load %arg4[%c3_59, %c0_60, %c0_61] : memref<7x8x8xf32, #tpu.memory_space<vmem>>, vector<1x8x8xf32>
    %77 = vector.shape_cast %76 : vector<1x8x8xf32> to vector<8x8xf32>
    %cst_62 = arith.constant dense<0.000000e+00> : vector<28x8xf32>
    %78 = tpu.matmul %75, %77, %cst_62 {dimension_numbers = #tpu.dot_dimension_numbers<[1], [0], [0], [1], [0, 0, 1, 1], [], []>} : vector<28x8xf32>, vector<8x8xf32>, vector<28x8xf32> -> vector<28x8xf32>
    %79 = arith.addf %74, %78 : vector<28x8xf32>
    %c4_63 = arith.constant 4 : index
    %c0_64 = arith.constant 0 : index
    %80 = tpu.strided_load %arg11[%c4_63, %c0_64] {strides = array<i32: 2, 1>} : memref<61x8xf32, #tpu.memory_space<vmem>>, vector<28x8xf32>
    %c4_65 = arith.constant 4 : index
    %c0_66 = arith.constant 0 : index
    %c0_67 = arith.constant 0 : index
    %81 = vector.load %arg4[%c4_65, %c0_66, %c0_67] : memref<7x8x8xf32, #tpu.memory_space<vmem>>, vector<1x8x8xf32>
    %82 = vector.shape_cast %81 : vector<1x8x8xf32> to vector<8x8xf32>
    %cst_68 = arith.constant dense<0.000000e+00> : vector<28x8xf32>
    %83 = tpu.matmul %80, %82, %cst_68 {dimension_numbers = #tpu.dot_dimension_numbers<[1], [0], [0], [1], [0, 0, 1, 1], [], []>} : vector<28x8xf32>, vector<8x8xf32>, vector<28x8xf32> -> vector<28x8xf32>
    %84 = arith.addf %79, %83 : vector<28x8xf32>
    %c5_69 = arith.constant 5 : index
    %c0_70 = arith.constant 0 : index
    %85 = tpu.strided_load %arg11[%c5_69, %c0_70] {strides = array<i32: 2, 1>} : memref<61x8xf32, #tpu.memory_space<vmem>>, vector<28x8xf32>
    %c5_71 = arith.constant 5 : index
    %c0_72 = arith.constant 0 : index
    %c0_73 = arith.constant 0 : index
    %86 = vector.load %arg4[%c5_71, %c0_72, %c0_73] : memref<7x8x8xf32, #tpu.memory_space<vmem>>, vector<1x8x8xf32>
    %87 = vector.shape_cast %86 : vector<1x8x8xf32> to vector<8x8xf32>
    %cst_74 = arith.constant dense<0.000000e+00> : vector<28x8xf32>
    %88 = tpu.matmul %85, %87, %cst_74 {dimension_numbers = #tpu.dot_dimension_numbers<[1], [0], [0], [1], [0, 0, 1, 1], [], []>} : vector<28x8xf32>, vector<8x8xf32>, vector<28x8xf32> -> vector<28x8xf32>
    %89 = arith.addf %84, %88 : vector<28x8xf32>
    %c6_75 = arith.constant 6 : index
    %c0_76 = arith.constant 0 : index
    %90 = tpu.strided_load %arg11[%c6_75, %c0_76] {strides = array<i32: 2, 1>} : memref<61x8xf32, #tpu.memory_space<vmem>>, vector<28x8xf32>
    %c6_77 = arith.constant 6 : index
    %c0_78 = arith.constant 0 : index
    %c0_79 = arith.constant 0 : index
    %91 = vector.load %arg4[%c6_77, %c0_78, %c0_79] : memref<7x8x8xf32, #tpu.memory_space<vmem>>, vector<1x8x8xf32>
    %92 = vector.shape_cast %91 : vector<1x8x8xf32> to vector<8x8xf32>
    %cst_80 = arith.constant dense<0.000000e+00> : vector<28x8xf32>
    %93 = tpu.matmul %90, %92, %cst_80 {dimension_numbers = #tpu.dot_dimension_numbers<[1], [0], [0], [1], [0, 0, 1, 1], [], []>} : vector<28x8xf32>, vector<8x8xf32>, vector<28x8xf32> -> vector<28x8xf32>
    %94 = arith.addf %89, %93 : vector<28x8xf32>
    %c0_81 = arith.constant 0 : index
    %c0_82 = arith.constant 0 : index
    %95 = vector.load %arg5[%c0_81, %c0_82] : memref<1x8xf32, #tpu.memory_space<vmem>>, vector<1x8xf32>
    %96 = vector.broadcast %95 : vector<1x8xf32> to vector<28x8xf32>
    %97 = arith.addf %94, %96 : vector<28x8xf32>
    %cst_83 = arith.constant 0.000000e+00 : f32
    %98 = vector.broadcast %cst_83 : f32 to vector<28x8xf32>
    %99 = arith.maximumf %97, %98 : vector<28x8xf32>
    %cst_84 = arith.constant dense<0.000000e+00> : vector<8xf32>
    %100 = vector.multi_reduction <add>, %99, %cst_84 [0] : vector<28x8xf32> to vector<8xf32>
    %101 = vector.shape_cast %100 : vector<8xf32> to vector<1x8xf32>
    %cst_85 = arith.constant 0.0357142873 : f32
    %102 = vector.broadcast %cst_85 : f32 to vector<1x8xf32>
    %103 = arith.mulf %101, %102 : vector<1x8xf32>
    %c0_86 = arith.constant 0 : index
    %c0_87 = arith.constant 0 : index
    %104 = vector.load %arg6[%c0_86, %c0_87] : memref<8x32xf32, #tpu.memory_space<vmem>>, vector<8x32xf32>
    %cst_88 = arith.constant dense<0.000000e+00> : vector<1x32xf32>
    %105 = tpu.matmul %103, %104, %cst_88 {dimension_numbers = #tpu.dot_dimension_numbers<[1], [0], [0], [1], [0, 0, 1, 1], [], []>} : vector<1x8xf32>, vector<8x32xf32>, vector<1x32xf32> -> vector<1x32xf32>
    %c0_89 = arith.constant 0 : index
    %c0_90 = arith.constant 0 : index
    %106 = vector.load %arg7[%c0_89, %c0_90] : memref<1x32xf32, #tpu.memory_space<vmem>>, vector<1x32xf32>
    %107 = arith.addf %105, %106 : vector<1x32xf32>
    %cst_91 = arith.constant 0.000000e+00 : f32
    %108 = vector.broadcast %cst_91 : f32 to vector<1x32xf32>
    %109 = arith.maximumf %107, %108 : vector<1x32xf32>
    %c0_92 = arith.constant 0 : index
    %c0_93 = arith.constant 0 : index
    %110 = vector.load %arg8[%c0_92, %c0_93] : memref<32x4xf32, #tpu.memory_space<vmem>>, vector<32x4xf32>
    %cst_94 = arith.constant dense<0.000000e+00> : vector<1x4xf32>
    %111 = tpu.matmul %109, %110, %cst_94 {dimension_numbers = #tpu.dot_dimension_numbers<[1], [0], [0], [1], [0, 0, 1, 1], [], []>} : vector<1x32xf32>, vector<32x4xf32>, vector<1x4xf32> -> vector<1x4xf32>
    %c0_95 = arith.constant 0 : index
    %c0_96 = arith.constant 0 : index
    %112 = vector.load %arg9[%c0_95, %c0_96] : memref<1x4xf32, #tpu.memory_space<vmem>>, vector<1x4xf32>
    %113 = arith.addf %111, %112 : vector<1x4xf32>
    %c0_97 = arith.constant 0 : index
    %c0_98 = arith.constant 0 : index
    %c0_99 = arith.constant 0 : index
    %114 = vector.load %arg10[%c0_97, %c0_98, %c0_99] : memref<1x1x4xf32, #tpu.memory_space<vmem>>, vector<1x1x4xf32>
    %115 = vector.shape_cast %114 : vector<1x1x4xf32> to vector<1x4xf32>
    %116 = vector.shape_cast %113 : vector<1x4xf32> to vector<1x1x4xf32>
    tpu.vector_store %arg10[%c0_97, %c0_98, %c0_99], %116 {strides = array<i32>} : memref<1x1x4xf32, #tpu.memory_space<vmem>>, vector<1x1x4xf32>,
    return
  }
  func.func @transform_0(%arg0: i32) -> (i32, i32, i32) {
    %c0_i32 = arith.constant 0 : i32
    %c0_i32_0 = arith.constant 0 : i32
    %c0_i32_1 = arith.constant 0 : i32
    return %arg0, %c0_i32, %c0_i32_0 : i32, i32, i32
  }
  func.func @transform_1(%arg0: i32) -> (i32, i32, i32) {
    %c0_i32 = arith.constant 0 : i32
    %c0_i32_0 = arith.constant 0 : i32
    %c0_i32_1 = arith.constant 0 : i32
    %c0_i32_2 = arith.constant 0 : i32
    return %c0_i32, %c0_i32_0, %c0_i32_1 : i32, i32, i32
  }
  func.func @transform_2(%arg0: i32) -> (i32, i32) {
    %c0_i32 = arith.constant 0 : i32
    %c0_i32_0 = arith.constant 0 : i32
    %c0_i32_1 = arith.constant 0 : i32
    return %c0_i32, %c0_i32_0 : i32, i32
  }
  func.func @transform_3(%arg0: i32) -> (i32, i32, i32) {
    %c0_i32 = arith.constant 0 : i32
    %c0_i32_0 = arith.constant 0 : i32
    %c0_i32_1 = arith.constant 0 : i32
    %c0_i32_2 = arith.constant 0 : i32
    return %c0_i32, %c0_i32_0, %c0_i32_1 : i32, i32, i32
  }
  func.func @transform_4(%arg0: i32) -> (i32, i32) {
    %c0_i32 = arith.constant 0 : i32
    %c0_i32_0 = arith.constant 0 : i32
    %c0_i32_1 = arith.constant 0 : i32
    return %c0_i32, %c0_i32_0 : i32, i32
  }
  func.func @transform_5(%arg0: i32) -> (i32, i32) {
    %c0_i32 = arith.constant 0 : i32
    %c0_i32_0 = arith.constant 0 : i32
    %c0_i32_1 = arith.constant 0 : i32
    return %c0_i32, %c0_i32_0 : i32, i32
  }
  func.func @transform_6(%arg0: i32) -> (i32, i32) {
    %c0_i32 = arith.constant 0 : i32
    %c0_i32_0 = arith.constant 0 : i32
    %c0_i32_1 = arith.constant 0 : i32
    return %c0_i32, %c0_i32_0 : i32, i32
  }
  func.func @transform_7(%arg0: i32) -> (i32, i32) {
    %c0_i32 = arith.constant 0 : i32
    %c0_i32_0 = arith.constant 0 : i32
    %c0_i32_1 = arith.constant 0 : i32
    return %c0_i32, %c0_i32_0 : i32, i32
  }
  func.func @transform_8(%arg0: i32) -> (i32, i32) {
    %c0_i32 = arith.constant 0 : i32
    %c0_i32_0 = arith.constant 0 : i32
    %c0_i32_1 = arith.constant 0 : i32
    return %c0_i32, %c0_i32_0 : i32, i32
  }
  func.func @transform_9(%arg0: i32) -> (i32, i32, i32) {
    %c0_i32 = arith.constant 0 : i32
    %c0_i32_0 = arith.constant 0 : i32
    %c0_i32_1 = arith.constant 0 : i32
    return %arg0, %c0_i32, %c0_i32_0 : i32, i32, i32
  }
}

</mosaic_0001>

<bundles_post_ra>
// kernel: _lambda_.1
= control target key start
LH: loop header
LB: loop body
LE: loop exit
PB: predicated region body
PF: predicated region fallthrough
CT: control target
= control target key end

     0   :  { %14 = vsyncpa [#allocation4], 0  ;;  %s2769_s0 = inlined_call_operand.vmem [shape: f32[2,128,1], index: 0, kind: input, shape index: {}]   ;;  %s2770_s1 = inlined_call_operand.vmem [shape: f32[7,1,8], index: 1, kind: input, shape index: {}]   ;;  %s2771_s2 = inlined_call_operand.vmem [shape: f32[1,8], index: 2, kind: input, shape index: {}]   ;;  %s2772_s3 = inlined_call_operand.vmem [shape: f32[7,8,8], index: 3, kind: input, shape index: {}]   ;;  %s2773_s4 = inlined_call_operand.vmem [shape: f32[1,8], index: 4, kind: input, shape index: {}]   ;;  %s2774_s5 = inlined_call_operand.vmem [shape: f32[8,32], index: 5, kind: input, shape index: {}]   ;;  %s2775_s6 = inlined_call_operand.vmem [shape: f32[1,32], index: 6, kind: input, shape index: {}]   ;;  %s2776_s7 = inlined_call_operand.vmem [shape: f32[32,4], index: 7, kind: input, shape index: {}]   ;;  %s2777_s8 = inlined_call_operand.vmem [shape: f32[1,4], index: 8, kind: input, shape index: {}]   ;;  %s2778_s9 = inlined_call_operand.hbm [shape: f32[2,1,4], index: 9, kind: output, shape index: {}]  }
   0x1   :  { %16 = vsyncpa [#allocation4 + $0x1], 0  ;;  %s2359_s30 = smov 0   ;;  %s2361_s10 = smov 0  }
   0x2   :  { %s2363_s11 = smov 0   ;;  %s2365_s12 = smov 0  }
   0x3 LB: > { %s2380_s13 = sadd.s32 4294967295, %s2302_s12   ;;  %s1935_s14 = sadd.s32 4294967294, %s2302_s12   ;;  %s2302_s12 = sphi %s2365_s12, %s2784_s12   ;;  %s2298_s11 = sphi %s2363_s11, %s2783_s11   ;;  %s2294_s10 = sphi %s2361_s10, %s2782_s10   ;;  %s2290_s30 = sphi %s2359_s30, %s2781_s30  }
   0x4   : > { %s2384_s15 = sadd.s32 1, %s2302_s12   ;;  %s223_s16 = sadd.s32 1, %s2298_s11 }
   0x5   : > { %s220_s17 = ssub.s32 %s2302_s12, %s2384_s15  ;;  %p233_p0 = scmp.ne.s32.totalorder %s2298_s11, %s2294_s10 }
   0x6   : > { %p221_p1 = scmp.eq.s32.totalorder %s220_s17, 0  ;;  %p234_p2 = scmp.eq.s32.totalorder %s2380_s13, 1 }
   0x7   : > { %p239_p3 = scmp.ne.s32.totalorder %s2294_s10, %s2290_s30  ;;  %p240_p4 = scmp.eq.s32.totalorder %s1935_s14, 1 }
   0x8   : > { %s2395_s18 = scalar_select %p221_p1, %s2298_s11, %s223_s16  }
   0x9   : > { %p2397_p5 = por %p234_p2, %p233_p0  ;;  %p2401_p6 = por %p240_p4, %p239_p3 }
   0xa   : > { %p1938_p7 = scmp.ge.s32.totalorder %s2302_s12, 1  ;;  %p290_p8 = scmp.lt.s32.totalorder %s2302_s12, 3 }
   0xc   : > { %p291_p9 = pnand %p1938_p7, %p290_p8 }
   0xd   : > { %p325_p10 = scmp.lt.s32.totalorder (!%p291_p9), %s2380_s13, 1  ;;  %v2304_v0 = vmov (!%p291_p9), 0   ;;  %v2010_v57 = vld [vmem:[%s2772_s3 + $0x8] sm:$0xff] (!%p291_p9)  ;;  %v2024_v58 = vld [vmem:[%s2772_s3 + $0x18] sm:$0xff] (!%p291_p9)  ;;  %v2479_v59 = vld [vmem:[%s2772_s3 + $0x20] sm:$0xff] (!%p291_p9)  ;;  %vm903_vm0 = vcmask (!%p291_p9), 64512  }
   0xe   : > { %294 = sbr.rel (%p291_p9) target bundleno = 987 (0x3db), region = 56  ;;  %2239 = vset.pattern.permute.xlu1 (!%p291_p9), %v2304_v0  ;;  %2238 = vset.pattern.permute.xlu0 (!%p291_p9), %v2304_v0  ;;  %v2485_v60 = vld [vmem:[%s2772_s3] sm:$0xff] (!%p291_p9)  ;;  %vm911_vm1 = vcmask (!%p291_p9), 61440   ;;  %vm2306_vm2 = vmmov (!%p291_p9), 0   ;;  %vm1700_vm3 = vcmask (!%p291_p9), 60416   ;;  %vm1791_vm4 = vcmask (!%p291_p9), 261120  }
   0xf   : > { %2093 = vmatprep.subr.mxu1 (!%p291_p9), %v2010_v57  ;;  %2117 = vmatprep.subr.mxu0 (!%p291_p9), %v2024_v58  ;;  %v2491_v63 = vld [vmem:[%s2770_s1] ss:$0 sm:$0xff] (!%p291_p9)  ;;  %v2496_v0 = vld [vmem:[%s2770_s1 + $0x1] ss:$0 sm:$0xff] (!%p291_p9)  ;;  %vm1865_vm5 = vcmask (!%p291_p9), 24576  }
  0x10   : > { %2094 = vmatpush3.msra.mxu1 (!%p291_p9), %v2010_v57  ;;  %2118 = vmatpush3.msra.mxu0 (!%p291_p9), %v2024_v58  ;;  %v2549_v57 = vld [vmem:[%s2770_s1 + $0x3] ss:$0 sm:$0xff] (!%p291_p9) }
  0x11   : > { %2125 = vmatprep.subr.mxu0 (!%p291_p9), %v2479_v59  ;;  %2101 = vmatprep.subr.mxu1 (!%p291_p9), %v2485_v60 }
  0x15   : > { %s326_s21 = scalar_select %p325_p10, %s2380_s13, 1 }
  0x17   : > { %s2050_s22 = sshll.u32 %s326_s21, 7 }
  0x18   : > { %s2412_s25 = scalar_lea.vmem %s2769_s0, %s2050_s22  ;;  %s323_s22 = sand.u32 1, %s2294_s10  }
  0x19   : > { %v1942_v1 = vld [vmem:[%s2412_s25 + $0x20] ss:$2 sm:$0xff]  ;;  %v1949_v3 = vld [vmem:[%s2412_s25 + $0x1] ss:$2 sm:$0xff]  ;;  %v1941_v4 = vld [vmem:[%s2412_s25 + $0x10] ss:$2 sm:$0xff] }
  0x1a   : > { %v330_v2 = vld [vmem:[%s2412_s25] ss:$2 sm:$0xff]  ;;  %358 = vperm.xlu1 %2239, %v1942_v1   ;;  %v1951_v5 = vld [vmem:[%s2412_s25 + $0x21] ss:$2 sm:$0xff]  ;;  %v1950_v6 = vld [vmem:[%s2412_s25 + $0x11] ss:$2 sm:$0xff] }
  0x1b   : > { %348 = vperm.xlu0 %2238, %v330_v2   ;;  %v1944_v7 = vld [vmem:[%s2412_s25 + $0x40] ss:$2 sm:$0xff]  ;;  %v1943_v8 = vld [vmem:[%s2412_s25 + $0x30] ss:$2 sm:$0xff]  ;;  %v1953_v9 = vld [vmem:[%s2412_s25 + $0x41] ss:$2 sm:$0xff] }
  0x1c   : > { %v1952_v10 = vld [vmem:[%s2412_s25 + $0x31] ss:$2 sm:$0xff]  ;;  %v1960_v11 = vld [vmem:[%s2412_s25 + $0x12] ss:$2 sm:$0xff]  ;;  %v1959_v12 = vld [vmem:[%s2412_s25 + $0x2] ss:$2 sm:$0xff] }
  0x1d   : > { %v1962_v13 = vld [vmem:[%s2412_s25 + $0x32] ss:$2 sm:$0xff]  ;;  %v1961_v14 = vld [vmem:[%s2412_s25 + $0x22] ss:$2 sm:$0xff]  ;;  %v1954_v17 = vld [vmem:[%s2412_s25 + $0x51] ss:$2 sm:$0xff] }
  0x1e   : > { %420 = vperm.xlu1 %2239, %v1949_v3   ;;  %v1945_v15 = vld [vmem:[%s2412_s25 + $0x50] ss:$2 sm:$0xff]  ;;  %v1946_v18 = vld [vmem:[%s2412_s25 + $0x60] ss:$2 sm:$0xff]  ;;  %v1969_v19 = vld [vmem:[%s2412_s25 + $0x3] ss:$2 sm:$0xff] }
  0x1f   : > { %353 = vperm.xlu0 %2238, %v1941_v4   ;;  %v1963_v16 = vld [vmem:[%s2412_s25 + $0x42] ss:$2 sm:$0xff]  ;;  %v1955_v20 = vld [vmem:[%s2412_s25 + $0x61] ss:$2 sm:$0xff]  ;;  %v1964_v28 = vld [vmem:[%s2412_s25 + $0x52] ss:$2 sm:$0xff] }
  0x20   : > { %v1971_v21 = vld [vmem:[%s2412_s25 + $0x23] ss:$2 sm:$0xff]  ;;  %v1970_v22 = vld [vmem:[%s2412_s25 + $0x13] ss:$2 sm:$0xff]  ;;  %v1965_v27 = vld [vmem:[%s2412_s25 + $0x62] ss:$2 sm:$0xff] }
  0x21   : > { %v1956_v23 = vld [vmem:[%s2412_s25 + $0x71] ss:$2 sm:$0x1f]  ;;  %v1947_v24 = vld [vmem:[%s2412_s25 + $0x70] ss:$2 sm:$0x1f] }
  0x22   : > { %430 = vperm.xlu1 %2239, %v1951_v5   ;;  %v1973_v25 = vld [vmem:[%s2412_s25 + $0x43] ss:$2 sm:$0xff]  ;;  %v1972_v26 = vld [vmem:[%s2412_s25 + $0x33] ss:$2 sm:$0xff]  ;;  %v1980_v29 = vld [vmem:[%s2412_s25 + $0x14] ss:$2 sm:$0xff] }
  0x23   : > { %425 = vperm.xlu0 %2238, %v1950_v6   ;;  %v1979_v30 = vld [vmem:[%s2412_s25 + $0x4] ss:$2 sm:$0xff]  ;;  %v1982_v34 = vld [vmem:[%s2412_s25 + $0x34] ss:$2 sm:$0xff]  ;;  %v1975_v35 = vld [vmem:[%s2412_s25 + $0x63] ss:$2 sm:$0xff] }
  0x24   : > { %v1966_v31 = vld [vmem:[%s2412_s25 + $0x72] ss:$2 sm:$0x1f]  ;;  %v1974_v36 = vld [vmem:[%s2412_s25 + $0x53] ss:$2 sm:$0xff]  ;;  %s324_s26 = scalar_lea.vmem [#allocation3], %s323_s22 }
  0x25   : > { %v1981_v32 = vld [vmem:[%s2412_s25 + $0x24] ss:$2 sm:$0xff]  ;;  %v1990_v37 = vld [vmem:[%s2412_s25 + $0x15] ss:$2 sm:$0xff]  ;;  %v1989_v38 = vld [vmem:[%s2412_s25 + $0x5] ss:$2 sm:$0xff] }
  0x26   : > { %368 = vperm.xlu1 %2239, %v1944_v7   ;;  %v1983_v33 = vld [vmem:[%s2412_s25 + $0x44] ss:$2 sm:$0xff]  ;;  %v1976_v39 = vld [vmem:[%s2412_s25 + $0x73] ss:$2 sm:$0x1f]  ;;  %s1880_s27 = sshll.u32 %s324_s26, 4  ;;  %s2729_s27 = int_to_ptr.vmem [resolvable:$true] %s1880_s27 }
  0x27   : > { %363 = vperm.xlu0 %2238, %v1943_v8   ;;  %v1991_v40 = vld [vmem:[%s2412_s25 + $0x25] ss:$2 sm:$0xff]  ;;  %v1992_v42 = vld [vmem:[%s2412_s25 + $0x35] ss:$2 sm:$0xff]  ;;  %v1985_v43 = vld [vmem:[%s2412_s25 + $0x64] ss:$2 sm:$0xff] }
  0x28   : > { %v1993_v41 = vld [vmem:[%s2412_s25 + $0x45] ss:$2 sm:$0xff]  ;;  %v1984_v44 = vld [vmem:[%s2412_s25 + $0x54] ss:$2 sm:$0xff]  ;;  %v1994_v52 = vld [vmem:[%s2412_s25 + $0x55] ss:$2 sm:$0xff] }
  0x29   : > { %v2000_v45 = vld [vmem:[%s2412_s25 + $0x16] ss:$2 sm:$0xff]  ;;  %v1999_v46 = vld [vmem:[%s2412_s25 + $0x6] ss:$2 sm:$0xff]  ;;  %v1995_v51 = vld [vmem:[%s2412_s25 + $0x65] ss:$2 sm:$0xff] }
  0x2a   : > { %440 = vperm.xlu1 %2239, %v1953_v9   ;;  %v1986_v47 = vld [vmem:[%s2412_s25 + $0x74] ss:$2 sm:$0x1f]  ;;  %v1996_v54 = vld [vmem:[%s2412_s25 + $0x75] ss:$2 sm:$0x1f] }
  0x2b   : > { %435 = vperm.xlu0 %2238, %v1952_v10   ;;  %v2001_v48 = vld [vmem:[%s2412_s25 + $0x26] ss:$2 sm:$0xff]  ;;  %v2002_v50 = vld [vmem:[%s2412_s25 + $0x36] ss:$2 sm:$0xff]  ;;  %s1868_s16 = scalar_lea.sflag [#allocation4], %s323_s22  ;;  %s2240_s17 = scalar_lea.vmem %s2729_s27, 16 }
  0x2c   : > { %v2003_v49 = vld [vmem:[%s2412_s25 + $0x46] ss:$2 sm:$0xff]  ;;  %v2004_v53 = vld [vmem:[%s2412_s25 + $0x56] ss:$2 sm:$0xff]  ;;  %p2241_p11 = scmp.ne.s32.totalorder %s2729_s27, %s2240_s17 }
  0x2d   : > { %v2006_v55 = vld [vmem:[%s2412_s25 + $0x76] ss:$2 sm:$0x1f]  ;;  %v2005_v56 = vld [vmem:[%s2412_s25 + $0x66] ss:$2 sm:$0xff]  ;;  %s2047_s25 = sshll.u32 %s2380_s13, 4 }
  0x2e   : > { %505 = vperm.xlu1 %2239, %v1960_v11   ;;  %s2727_s14 = scalar_lea.hbm %s2778_s9, %s2047_s25  ;;  %p2242_p12 = pnand %p2241_p11, %p2397_p5 }
  0x2f   : > { %500 = vperm.xlu0 %2238, %v1959_v12   ;;  %s2308_s13 = smov [#allocation3]  }
  0x30   : > { %p2243_p13 = pneg %p2242_p12  ;;  %s2244_s21 = sshll.u32 %s2308_s13, 4  ;;  %s2245_s21 = int_to_ptr.vmem [resolvable:$false] %s2244_s21 }
  0x31   : > { %s2246_s23 = scalar_lea.vmem %s2245_s21, 32  ;;  %p2247_p0 = scmp.lt.s32.totalorder %s2729_s27, %s2245_s21 }
  0x32   : > { %515 = vperm.xlu1 %2239, %v1962_v13   ;;  %p2248_p1 = scmp.lt.s32.totalorder %s2246_s23, %s2240_s17 }
  0x33   : > { %510 = vperm.xlu0 %2238, %v1961_v14  }
  0x34   : > { %p2249_p2 = por %p2248_p1, %p2247_p0 }
  0x36   : > { %373 = vperm.xlu1 %2239, %v1945_v15   ;;  %p2250_p3 = pnand %p2249_p2, %p2243_p13 }
  0x37   : > { %520 = vperm.xlu0 %2238, %v1963_v16  }
  0x3a   : > { %445 = vperm.xlu1 %2239, %v1954_v17  }
  0x3b   : > { %378 = vperm.xlu0 %2238, %v1946_v18  }
  0x3e   : > { %580 = vperm.xlu1 %2239, %v1969_v19  }
  0x3f   : > { %450 = vperm.xlu0 %2238, %v1955_v20  }
  0x42   : > { %590 = vperm.xlu1 %2239, %v1971_v21  }
  0x43   : > { %585 = vperm.xlu0 %2238, %v1970_v22  }
  0x46   : > { %455 = vperm.xlu1 %2239, %v1956_v23  }
  0x47   : > { %383 = vperm.xlu0 %2238, %v1947_v24  }
  0x4a   : > { %600 = vperm.xlu1 %2239, %v1973_v25  }
  0x4b   : > { %595 = vperm.xlu0 %2238, %v1972_v26   ;;  %v2517_v26 = vld [vmem:[%s2770_s1 + $0x2] ss:$0 sm:$0xff] }
  0x4e   : > { %530 = vperm.xlu1 %2239, %v1965_v27  }
  0x4f   : > { %525 = vperm.xlu0 %2238, %v1964_v28  }
  0x52   : > { %665 = vperm.xlu1 %2239, %v1980_v29  }
  0x53   : > { %660 = vperm.xlu0 %2238, %v1979_v30  }
  0x56   : > { %535 = vperm.xlu1 %2239, %v1966_v31  }
  0x57   : > { %670 = vperm.xlu0 %2238, %v1981_v32  }
  0x5a   : > { %680 = vperm.xlu1 %2239, %v1983_v33  }
  0x5b   : > { %675 = vperm.xlu0 %2238, %v1982_v34  }
  0x5e   : > { %610 = vperm.xlu1 %2239, %v1975_v35  }
  0x5f   : > { %605 = vperm.xlu0 %2238, %v1974_v36  }
  0x62   : > { %745 = vperm.xlu1 %2239, %v1990_v37  }
  0x63   : > { %740 = vperm.xlu0 %2238, %v1989_v38  }
  0x66   : > { %615 = vperm.xlu1 %2239, %v1976_v39  }
  0x67   : > { %750 = vperm.xlu0 %2238, %v1991_v40  }
  0x6a   : > { %760 = vperm.xlu1 %2239, %v1993_v41  }
  0x6b   : > { %755 = vperm.xlu0 %2238, %v1992_v42  }
  0x6e   : > { %690 = vperm.xlu1 %2239, %v1985_v43  }
  0x6f   : > { %685 = vperm.xlu0 %2238, %v1984_v44  }
  0x72   : > { %825 = vperm.xlu1 %2239, %v2000_v45  }
  0x73   : > { %820 = vperm.xlu0 %2238, %v1999_v46  }
  0x76   : > { %695 = vperm.xlu1 %2239, %v1986_v47  }
  0x77   : > { %830 = vperm.xlu0 %2238, %v2001_v48  }
  0x7a   : > { %840 = vperm.xlu1 %2239, %v2003_v49  }
  0x7b   : > { %835 = vperm.xlu0 %2238, %v2002_v50  }
  0x7e   : > { %770 = vperm.xlu1 %2239, %v1995_v51  }
  0x7f   : > { %765 = vperm.xlu0 %2238, %v1994_v52  }
  0x82   : > { %845 = vperm.xlu1 %2239, %v2004_v53  }
  0x83   : > { %775 = vperm.xlu0 %2238, %v1996_v54  }
  0x86   : > { %855 = vperm.xlu1 %2239, %v2006_v55  }
  0x87   : > { %850 = vperm.xlu0 %2238, %v2005_v56  }
  0x99   : > { %v359_v61 = vpop.permute.xlu1 %358 }
  0x9a   : > { %v349_v62 = vpop.permute.xlu0 %348  ;;  %v394_v8 = vmul.f32 %v2491_v63, %v359_v61 }
  0x9b   : > { %v392_v3 = vmul.f32 %v2491_v63, %v349_v62  ;;  %v2556_v62 = vld [vmem:[%s2770_s1 + $0x4] ss:$0 sm:$0xff] }
  0x9d   : > { %v421_v1 = vpop.permute.xlu1 %420 }
  0x9e   : > { %v354_v2 = vpop.permute.xlu0 %353  ;;  %v464_v4 = vmul.f32 %v2496_v0, %v421_v1 }
  0x9f   : > { %v393_v9 = vmul.f32 %v2491_v63, %v354_v2 }
  0xa0   : > { %v2500_v5 = vadd.f32 %v464_v4, %v392_v3 }
  0xa1   : > { %v431_v6 = vpop.permute.xlu1 %430 }
  0xa2   : > { %v426_v7 = vpop.permute.xlu0 %425  ;;  %v466_v10 = vmul.f32 %v2496_v0, %v431_v6 }
  0xa3   : > { %v465_v11 = vmul.f32 %v2496_v0, %v426_v7  ;;  %v2564_v7 = vld [vmem:[%s2770_s1 + $0x5] ss:$0 sm:$0xff] }
  0xa4   : > { %v2506_v12 = vadd.f32 %v466_v10, %v394_v8 }
  0xa5   : > { %v473_v13 = vadd.f32 %v465_v11, %v393_v9  ;;  %v369_v14 = vpop.permute.xlu1 %368 }
  0xa6   : > { %v364_v15 = vpop.permute.xlu0 %363  ;;  %v396_v18 = vmul.f32 %v2491_v63, %v369_v14 }
  0xa7   : > { %v395_v19 = vmul.f32 %v2491_v63, %v364_v15 }
  0xa9   : > { %v441_v16 = vpop.permute.xlu1 %440 }
  0xaa   : > { %v436_v17 = vpop.permute.xlu0 %435  ;;  %v468_v20 = vmul.f32 %v2496_v0, %v441_v16 }
  0xab   : > { %v467_v21 = vmul.f32 %v2496_v0, %v436_v17 }
  0xac   : > { %v2512_v22 = vadd.f32 %v468_v20, %v396_v18 }
  0xad   : > { %v475_v23 = vadd.f32 %v467_v21, %v395_v19  ;;  %v506_v24 = vpop.permute.xlu1 %505 }
  0xae   : > { %v501_v25 = vpop.permute.xlu0 %500  ;;  %v545_v58 = vmul.f32 %v2517_v26, %v506_v24 }
  0xaf   : > { %v544_v61 = vmul.f32 %v2517_v26, %v501_v25 }
  0xb0   : > { %v553_v8 = vadd.f32 %v545_v58, %v473_v13 }
  0xb1   : > { %v516_v27 = vpop.permute.xlu1 %515  ;;  %v552_v9 = vadd.f32 %v544_v61, %v2500_v5 }
  0xb2   : > { %v511_v28 = vpop.permute.xlu0 %510  ;;  %v547_v29 = vmul.f32 %v2517_v26, %v516_v27 }
  0xb3   : > { %v546_v6 = vmul.f32 %v2517_v26, %v511_v28 }
  0xb4   : > { %v2520_v30 = vadd.f32 %v547_v29, %v475_v23  ;;  %v2582_v23 = vld [vmem:[%s2770_s1 + $0x6] ss:$0 sm:$0xff] }
  0xb5   : > { %v2522_v31 = vpop.permute.xlu1 %373  ;;  %v554_v13 = vadd.f32 %v546_v6, %v2506_v12 }
  0xb6   : > { %v521_v32 = vpop.permute.xlu0 %520 }
  0xb7   : > { %v548_v5 = vmul.f32 %v2517_v26, %v521_v32 }
  0xb9   : > { %v2524_v33 = vpop.permute.xlu1 %445 }
  0xba   : > { %v2526_v34 = vpop.permute.xlu0 %378 }
  0xbd   : > { %v581_v35 = vpop.permute.xlu1 %580 }
  0xbe   : > { %v2528_v36 = vpop.permute.xlu0 %450  ;;  %v624_v3 = vmul.f32 %v2549_v57, %v581_v35 }
  0xc0   : > { %v632_v17 = vadd.f32 %v624_v3, %v552_v9 }
  0xc1   : > { %v591_v37 = vpop.permute.xlu1 %590 }
  0xc2   : > { %v586_v38 = vpop.permute.xlu0 %585  ;;  %v626_v14 = vmul.f32 %v2549_v57, %v591_v37 }
  0xc3   : > { %v625_v4 = vmul.f32 %v2549_v57, %v586_v38 }
  0xc4   : > { %v634_v27 = vadd.f32 %v626_v14, %v554_v13 }
  0xc5   : > { %v2530_v39 = vpop.permute.xlu1 %455  ;;  %v633_v18 = vadd.f32 %v625_v4, %v553_v8 }
  0xc6   : > { %v2532_v40 = vpop.permute.xlu0 %383 }
  0xc7   : > { %v399_v13 = vmul.f32 %v2491_v63, %v2532_v40 }
  0xc9   : > { %v601_v41 = vpop.permute.xlu1 %600 }
  0xca   : > { %v596_v42 = vpop.permute.xlu0 %595  ;;  %v628_v28 = vmul.f32 %v2549_v57, %v601_v41 }
  0xcb   : > { %v627_v29 = vmul.f32 %v2549_v57, %v596_v42  ;;  %v2596_v42 = vld [vmem:[%s2771_s2] ss:$0 sm:$0xff] }
  0xcd   : > { %v2534_v43 = vpop.permute.xlu1 %530 }
  0xce   : > { %v2536_v44 = vpop.permute.xlu0 %525  ;;  %v550_v40 = vmul.f32 %v2517_v26, %v2534_v43 }
  0xd1   : > { %v666_v45 = vpop.permute.xlu1 %665 }
  0xd2   : > { %v661_v46 = vpop.permute.xlu0 %660  ;;  %v705_v10 = vmul.f32 %v2556_v62, %v666_v45 }
  0xd3   : > { %v704_v11 = vmul.f32 %v2556_v62, %v661_v46 }
  0xd4   : > { %v713_v24 = vadd.f32 %v705_v10, %v633_v18 }
  0xd5   : > { %v2538_v47 = vpop.permute.xlu1 %535  ;;  %v712_v25 = vadd.f32 %v704_v11, %v632_v17 }
  0xd6   : > { %v671_v48 = vpop.permute.xlu0 %670 }
  0xd7   : > { %v706_v21 = vmul.f32 %v2556_v62, %v671_v48  ;;  %v556_v48 = vadd.f32 %v548_v5, %v2512_v22  ;;  %v635_v22 = vadd.f32 %v627_v29, %v2520_v30  ;;  %v549_v30 = vmul.f32 %v2517_v26, %v2536_v44 }
  0xd9   : > { %v681_v49 = vpop.permute.xlu1 %680  ;;  %v636_v4 = vadd.f32 %v628_v28, %v556_v48  ;;  %v551_v28 = vmul.f32 %v2517_v26, %v2538_v47 }
  0xda   : > { %v676_v50 = vpop.permute.xlu0 %675  ;;  %v708_v41 = vmul.f32 %v2556_v62, %v681_v49 }
  0xdb   : > { %v707_v58 = vmul.f32 %v2556_v62, %v676_v50  ;;  %v470_v50 = vmul.f32 %v2496_v0, %v2528_v36 }
  0xdc   : > { %v716_v17 = vadd.f32 %v708_v41, %v636_v4 }
  0xdd   : > { %v2540_v51 = vpop.permute.xlu1 %610  ;;  %v715_v18 = vadd.f32 %v707_v58, %v635_v22 }
  0xde   : > { %v2542_v52 = vpop.permute.xlu0 %605 }
  0xdf   : > { %v629_v5 = vmul.f32 %v2549_v57, %v2542_v52 }
  0xe1   : > { %v746_v53 = vpop.permute.xlu1 %745 }
  0xe2   : > { %v741_v54 = vpop.permute.xlu0 %740  ;;  %v785_v19 = vmul.f32 %v2564_v7, %v746_v53  ;;  %v469_v53 = vmul.f32 %v2496_v0, %v2524_v33 }
  0xe3   : > { %v784_v20 = vmul.f32 %v2564_v7, %v741_v54  ;;  %v714_v54 = vadd.f32 %v706_v21, %v634_v27 }
  0xe4   : > { %v793_v32 = vadd.f32 %v785_v19, %v713_v24 }
  0xe5   : > { %v2544_v55 = vpop.permute.xlu1 %615  ;;  %v792_v38 = vadd.f32 %v784_v20, %v712_v25 }
  0xe6   : > { %v751_v56 = vpop.permute.xlu0 %750  ;;  %v631_v43 = vmul.f32 %v2549_v57, %v2544_v55 }
  0xe7   : > { %v786_v35 = vmul.f32 %v2564_v7, %v751_v56  ;;  %v397_v56 = vmul.f32 %v2491_v63, %v2522_v31 }
  0xe9   : > { %v761_v1 = vpop.permute.xlu1 %760  ;;  %v794_v6 = vadd.f32 %v786_v35, %v714_v54  ;;  %v477_v14 = vadd.f32 %v469_v53, %v397_v56 }
  0xea   : > { %v756_v2 = vpop.permute.xlu0 %755  ;;  %v788_v33 = vmul.f32 %v2564_v7, %v761_v1 }
  0xeb   : > { %v787_v9 = vmul.f32 %v2564_v7, %v756_v2  ;;  %v471_v2 = vmul.f32 %v2496_v0, %v2530_v39  ;;  %v398_v39 = vmul.f32 %v2491_v63, %v2526_v34  ;;  %v557_v52 = vadd.f32 %v549_v30, %v477_v14 }
  0xec   : > { %v796_v21 = vadd.f32 %v788_v33, %v716_v17 }
  0xed   : > { %v2570_v15 = vpop.permute.xlu1 %690  ;;  %v795_v25 = vadd.f32 %v787_v9, %v715_v18 }
  0xee   : > { %v2572_v16 = vpop.permute.xlu0 %685  ;;  %v710_v54 = vmul.f32 %v2556_v62, %v2570_v15 }
  0xef   : > { %v709_v29 = vmul.f32 %v2556_v62, %v2572_v16 }
  0xf1   : > { %v826_v12 = vpop.permute.xlu1 %825 }
  0xf2   : > { %v821_v37 = vpop.permute.xlu0 %820  ;;  %v865_v45 = vmul.f32 %v2582_v23, %v826_v12 }
  0xf3   : > { %v864_v46 = vmul.f32 %v2582_v23, %v821_v37 }
  0xf4   : > { %v873_v61 = vadd.f32 %v865_v45, %v793_v32  ;;  %v478_v32 = vadd.f32 %v470_v50, %v398_v39  ;;  %v630_v45 = vmul.f32 %v2549_v57, %v2540_v51 }
  0xf5   : > { %v872_v3 = vadd.f32 %v864_v46, %v792_v38  ;;  %v696_v8 = vpop.permute.xlu1 %695  ;;  %v479_v38 = vadd.f32 %v471_v2, %v399_v13  ;;  %v637_v46 = vadd.f32 %v629_v5, %v557_v52  ;;  %v2019_v13 = vld [vmem:[%s2772_s3 + $0x10] sm:$0xff] }
  0xf6   : > { %v831_v49 = vpop.permute.xlu0 %830  ;;  %v888_v10 = vadd.f32 %v2596_v42, %v873_v61  ;;  %v558_v48 = vadd.f32 %v550_v40, %v478_v32  ;;  %v711_v41 = vmul.f32 %v2556_v62, %v696_v8  ;;  %v2039_v40 = vld [vmem:[%s2772_s3 + $0x30] sm:$0xff] }
  0xf7   : > { %v887_v11 = vadd.f32 %v2596_v42, %v872_v3  ;;  %v866_v31 = vmul.f32 %v2582_v23, %v831_v49  ;;  %v559_v53 = vadd.f32 %v551_v28, %v479_v38  ;;  %v717_v51 = vadd.f32 %v709_v29, %v637_v46 }
  0xf8   : > { %v896_v1 = vmax.f32 %v888_v10, 0.0  ;;  %v638_v61 = vadd.f32 %v630_v45, %v558_v48  ;;  %v2305_v48 = vmov 0.0  }
  0xf9   : > { %v895_v19 = vmax.f32 %v887_v11, 0.0  ;;  %v874_v20 = vadd.f32 %v866_v31, %v794_v6  ;;  %v841_v24 = vpop.permute.xlu1 %840  ;;  %v639_v22 = vadd.f32 %v631_v43, %v559_v53  ;;  %v2307_v53 = vmov 0.0|0.0  }
  0xfa   : > { %v836_v36 = vpop.permute.xlu0 %835  ;;  %905 = vst.msk [vmem:[#allocation2 + $0x8] sm:$0xff] %vm903_vm0, %v896_v1  ;;  %v868_v27 = vmul.f32 %v2582_v23, %v841_v24  ;;  %v718_v62 = vadd.f32 %v710_v54, %v638_v61  ;;  %v2044_v61 = vld [vmem:[%s2773_s4] ss:$0 sm:$0xff] }
  0xfb   : > { %904 = vst.msk [vmem:[#allocation2] sm:$0xff] %vm903_vm0, %v895_v19  ;;  %v889_v44 = vadd.f32 %v2596_v42, %v874_v20  ;;  %v867_v0 = vmul.f32 %v2582_v23, %v836_v36  ;;  %v719_v8 = vadd.f32 %v711_v41, %v639_v22  ;;  %v2034_v19 = vld [vmem:[%s2772_s3 + $0x28] sm:$0xff] }
  0xfc   : > { %v876_v12 = vadd.f32 %v868_v27, %v796_v21 }
  0xfd   : > { %v897_v35 = vmax.f32 %v889_v44, 0.0  ;;  %v875_v37 = vadd.f32 %v867_v0, %v795_v25  ;;  %v771_v63 = vpop.permute.xlu1 %770 }
  0xfe   : > { %v766_v34 = vpop.permute.xlu0 %765  ;;  %v891_v26 = vadd.f32 %v2596_v42, %v876_v12  ;;  %v790_v55 = vmul.f32 %v2564_v7, %v771_v63 }
  0xff   : > { %906 = vst.msk [vmem:[#allocation2 + $0x10] sm:$0xff] %vm903_vm0, %v897_v35  ;;  %v890_v47 = vadd.f32 %v2596_v42, %v875_v37  ;;  %v789_v16 = vmul.f32 %v2564_v7, %v766_v34 }
 0x100   : > { %v899_v56 = vmax.f32 %v891_v26, 0.0  ;;  %v798_v9 = vadd.f32 %v790_v55, %v718_v62 }
 0x101   : > { %v898_v58 = vmax.f32 %v890_v47, 0.0  ;;  %v846_v57 = vpop.permute.xlu1 %845  ;;  %v797_v6 = vadd.f32 %v789_v16, %v717_v51  ;;  %v1710_v16 = vld [vmem:[%s2774_s5] sm:$0xff] }
 0x102   : > { %v776_v3 = vpop.permute.xlu0 %775  ;;  %v922_v4 = vld [vmem:[#allocation2 + $0x1] ss:$2 sm:$0xff]  ;;  %908 = vst.msk [vmem:[#allocation2 + $0x20] sm:$0xff] %vm903_vm0, %v899_v56  ;;  %v869_v33 = vmul.f32 %v2582_v23, %v846_v57  ;;  %v913_v44 = vld [vmem:[#allocation2] ss:$2 sm:$0xff] }
 0x103   : > { %907 = vst.msk [vmem:[#allocation2 + $0x18] sm:$0xff] %vm903_vm0, %v898_v58  ;;  %v791_v15 = vmul.f32 %v2564_v7, %v776_v3  ;;  %2095 = vmatprep.mubr.msk.f32.mxu1 %vm903_vm0, %v922_v4 }
 0x104   : > { %v877_v49 = vadd.f32 %v869_v33, %v797_v6 }
 0x105   : > { %v856_v10 = vpop.permute.xlu1 %855  ;;  %v799_v50 = vadd.f32 %v791_v15, %v719_v8 }
 0x106   : > { %v851_v11 = vpop.permute.xlu0 %850  ;;  %v1237_v31 = vld [vmem:[#allocation2 + $0x3] ss:$2 sm:$0xff]  ;;  %v892_v14 = vadd.f32 %v2596_v42, %v877_v49  ;;  %v871_v30 = vmul.f32 %v2582_v23, %v856_v10  ;;  %v1126_v29 = vld [vmem:[#allocation2 + $0x2] ss:$2 sm:$0xff] }
 0x107   : > { %v870_v17 = vmul.f32 %v2582_v23, %v851_v11  ;;  %2119 = vmatprep.mubr.msk.f32.mxu0 %vm903_vm0, %v1237_v31  ;;  %v1459_v12 = vld [vmem:[#allocation2 + $0x5] ss:$2 sm:$0xff]  ;;  %v1570_v34 = vld [vmem:[#allocation2 + $0x6] ss:$2 sm:$0xff] }
 0x108   : > { %v900_v18 = vmax.f32 %v892_v14, 0.0  ;;  %v879_v7 = vadd.f32 %v871_v30, %v799_v50 }
 0x109   : > { %v878_v1 = vadd.f32 %v870_v17, %v798_v9 }
 0x10a   : > { %v924_v20 = vld [vmem:[#allocation2 + $0x11] ss:$2 sm:$0xff]  ;;  %909 = vst.msk [vmem:[#allocation2 + $0x28] sm:$0xff] %vm903_vm0, %v900_v18  ;;  %v894_v5 = vadd.f32 %v2596_v42, %v879_v7  ;;  %v915_v27 = vld [vmem:[#allocation2 + $0x10] ss:$2 sm:$0xff] }
 0x10b   : > { %v1239_v2 = vld [vmem:[#allocation2 + $0x13] ss:$2 sm:$0xff]  ;;  %v893_v23 = vadd.f32 %v2596_v42, %v878_v1  ;;  %2096 = vmatmul.mubr.msk.f32.vlgmr.msra.gmra.mrb[0].mxu1 %vm903_vm0, %v924_v20  ;;  %v1350_v39 = vld [vmem:[#allocation2 + $0x14] ss:$2 sm:$0xff] }
 0x10c   : > { %2120 = vmatmul.mubr.msk.f32.vlgmr.msra.gmra.mrb[0].mxu0 %vm903_vm0, %v1239_v2  ;;  %2102 = vmatpush3.msra.mxu1 %v2485_v60  ;;  %v902_v21 = vmax.f32 %v894_v5, 0.0  ;;  %v1348_v60 = vld [vmem:[#allocation2 + $0x4] ss:$2 sm:$0xff]  ;;  %v1461_v38 = vld [vmem:[#allocation2 + $0x15] ss:$2 sm:$0xff] }
 0x10d   : > { %2126 = vmatpush3.msra.mxu0 %v2479_v59  ;;  %v901_v24 = vmax.f32 %v893_v23, 0.0  ;;  %2109 = vmatprep.subr.mxu1 %v2019_v13  ;;  %v1128_v37 = vld [vmem:[#allocation2 + $0x12] ss:$2 sm:$0xff] }
 0x10e   : > { %2133 = vmatprep.subr.mxu0 %v2034_v19  ;;  %912 = vst.msk [vmem:[#allocation2 + $0x38] sm:$0x1f] %vm911_vm1, %v902_v21  ;;  %v1572_v43 = vld [vmem:[#allocation2 + $0x16] ss:$2 sm:$0xff]  ;;  %v1787_v21 = vld [vmem:[%s2776_s7 + $0x8] sm:$0xff] }
 0x10f   : > { %910 = vst.msk [vmem:[#allocation2 + $0x30] sm:$0xff] %vm903_vm0, %v901_v24  ;;  %v1786_v23 = vld [vmem:[%s2776_s7] sm:$0xff] }
 0x111   : > { %v926_v36 = vld [vmem:[#allocation2 + $0x21] ss:$2 sm:$0xff]  ;;  %v917_v0 = vld [vmem:[#allocation2 + $0x20] ss:$2 sm:$0xff] }
 0x112   : > { %2098 = vmatprep.mubr.msk.f32.mxu1 %vm903_vm0, %v926_v36  ;;  %v2166_v36 = vpack.c.bf16 %v1787_v21, %v1786_v23 }
 0x116   : > { %v928_v42 = vld [vmem:[#allocation2 + $0x31] ss:$2 sm:$0xf]  ;;  %v1352_v52 = vld [vmem:[#allocation2 + $0x24] ss:$2 sm:$0xff] }
 0x117   : > { %v1241_v25 = vld [vmem:[#allocation2 + $0x23] ss:$2 sm:$0xff]  ;;  %2099 = vmatmul.mubr.msk.f32.gmra.mrb[2].mxu1 %vm903_vm0, %v928_v42  ;;  %v1243_v59 = vld [vmem:[#allocation2 + $0x33] ss:$2 sm:$0xf] }
 0x118   : > { %2122 = vmatprep.mubr.msk.f32.mxu0 %vm903_vm0, %v1241_v25  ;;  %2103 = vmatprep.mubr.msk.f32.mxu1 %vm903_vm0, %v913_v44  ;;  %v919_v28 = vld [vmem:[#allocation2 + $0x30] ss:$2 sm:$0xf]  ;;  %v1463_v45 = vld [vmem:[#allocation2 + $0x25] ss:$2 sm:$0xff]  ;;  %v1789_v44 = vld [vmem:[%s2776_s7 + $0x18] sm:$0xff] }
 0x119   : > { %2123 = vmatmul.mubr.msk.f32.gmra.mrb[2].mxu0 %vm903_vm0, %v1243_v59  ;;  %v1354_v35 = vld [vmem:[#allocation2 + $0x34] ss:$2 sm:$0xf]  ;;  %v1130_v32 = vld [vmem:[#allocation2 + $0x22] ss:$2 sm:$0xff] }
 0x11a   : > { %2127 = vmatprep.mubr.msk.f32.mxu0 %vm903_vm0, %v1348_v60  ;;  %v1132_v46 = vld [vmem:[#allocation2 + $0x32] ss:$2 sm:$0xf]  ;;  %v1465_v63 = vld [vmem:[#allocation2 + $0x35] ss:$2 sm:$0xf] }
 0x11b   : > { %2104 = vmatmul.mubr.msk.f32.vlgmr.msra.gmra.mrb[0].mxu1 %vm903_vm0, %v915_v27  ;;  %v1574_v26 = vld [vmem:[#allocation2 + $0x26] ss:$2 sm:$0xff]  ;;  %v1576_v47 = vld [vmem:[#allocation2 + $0x36] ss:$2 sm:$0xf] }
 0x11c   : > { %2106 = vmatprep.mubr.msk.f32.mxu1 %vm903_vm0, %v917_v0  ;;  %2110 = vmatpush3.msra.mxu1 %v2019_v13  ;;  %v1788_v25 = vld [vmem:[%s2776_s7 + $0x10] sm:$0xff]  ;;  %v1711_v60 = vld [vmem:[%s2775_s6] sm:$0x1] }
 0x11d   : > { %2128 = vmatmul.mubr.msk.f32.vlgmr.msra.gmra.mrb[0].mxu0 %vm903_vm0, %v1350_v39  ;;  %2149 = vmatprep.subr.mxu1 %v2305_v48  ;;  %v2169_v59 = vpack.c.bf16 %v1789_v44, %v1788_v25 }
 0x11e   : > { %2134 = vmatpush3.msra.mxu0 %v2034_v19  ;;  %2130 = vmatprep.mubr.msk.f32.mxu0 %vm903_vm0, %v1352_v52  ;;  %v1790_v52 = vld [vmem:[%s2777_s8] sm:$0x1] }
 0x11f   : > { %2141 = vmatprep.subr.mxu0 %v2039_v40  ;;  %2107 = vmatmul.mubr.msk.f32.gmra.mrb[2].mxu1 %vm903_vm0, %v919_v28 }
 0x120   : > { %2111 = vmatprep.mubr.msk.f32.mxu1 %vm903_vm0, %v1126_v29 }
 0x121   : > { %2131 = vmatmul.mubr.msk.f32.gmra.mrb[2].mxu0 %vm903_vm0, %v1354_v35 }
 0x122   : > { %2135 = vmatprep.mubr.msk.f32.mxu0 %vm903_vm0, %v1459_v12 }
 0x123   : > { %2112 = vmatmul.mubr.msk.f32.vlgmr.msra.gmra.mrb[0].mxu1 %vm903_vm0, %v1128_v37 }
 0x124   : > { %2114 = vmatprep.mubr.msk.f32.mxu1 %vm903_vm0, %v1130_v32  ;;  %2150 = vmatpush3.msra.mxu1 %v1710_v16 }
 0x125   : > { %2136 = vmatmul.mubr.msk.f32.vlgmr.msra.gmra.mrb[0].mxu0 %vm903_vm0, %v1461_v38  ;;  %2165 = vmatprep.subr.bf16.mxu1 %v2307_v53 }
 0x126   : > { %2142 = vmatpush3.msra.mxu0 %v2039_v40  ;;  %2138 = vmatprep.mubr.msk.f32.mxu0 %vm903_vm0, %v1463_v45 }
 0x127   : > { %2115 = vmatmul.mubr.msk.f32.gmra.mrb[2].mxu1 %vm903_vm0, %v1132_v46 }
 0x128   : > { %2151 = vmatprep.mubr.msk.f32.mxu1 %vm2306_vm2, %v2305_v48 }
 0x129   : > { %2139 = vmatmul.mubr.msk.f32.gmra.mrb[2].mxu0 %vm903_vm0, %v1465_v63 }
 0x12a   : > { %2143 = vmatprep.mubr.msk.f32.mxu0 %vm903_vm0, %v1570_v34 }
 0x12d   : > { %2144 = vmatmul.mubr.msk.f32.vlgmr.msra.gmra.mrb[0].mxu0 %vm903_vm0, %v1572_v43 }
 0x12e   : > { %2146 = vmatprep.mubr.msk.f32.mxu0 %vm903_vm0, %v1574_v26 }
 0x131   : > { %2147 = vmatmul.mubr.msk.f32.gmra.mrb[2].mxu0 %vm903_vm0, %v1576_v47 }
 0x1f6   : > { %v2113_v54 = vpop.f32.mrb[0].mxu1 }
 0x1f7   : > { %v1213_v51 = vpop.f32.mrb[1].mxu1 }
 0x1fa   : > { %v2116_v41 = vpop.f32.mrb[2].mxu1 }
 0x1fb   : > { %v1223_v56 = vpop.f32.mrb[3].mxu1 }
 0x200   : > { %v2145_v58 = vpop.f32.mrb[0].mxu0 }
 0x201   : > { %v2171_v55 = vadd.f32 %v2145_v58, %v2113_v54  ;;  %v1657_v57 = vpop.f32.mrb[1].mxu0 }
 0x202   : > { %v2172_v3 = vadd.f32 %v1657_v57, %v1213_v51 }
 0x203   : > { %v1688_v4 = vadd.f32 %v2171_v55, %v2044_v61 }
 0x204   : > { %v1687_v22 = vadd.f32 %v2172_v3, %v2044_v61  ;;  %v2148_v6 = vpop.f32.mrb[2].mxu0 }
 0x205   : > { %v1692_v33 = vmax.f32 %v1688_v4, 0.0  ;;  %v2173_v15 = vadd.f32 %v2148_v6, %v2116_v41  ;;  %v1667_v62 = vpop.f32.mrb[3].mxu0 }
 0x206   : > { %v1691_v8 = vmax.f32 %v1687_v22, 0.0  ;;  %v2174_v49 = vadd.f32 %v1667_v62, %v1223_v56 }
 0x207   : > { %v1696_v9 = vsel %vm903_vm0, %v1692_v33, 0.0  ;;  %v1690_v10 = vadd.f32 %v2173_v15, %v2044_v61 }
 0x208   : > { %v1695_v11 = vsel %vm903_vm0, %v1691_v8, 0.0  ;;  %v1689_v31 = vadd.f32 %v2174_v49, %v2044_v61 }
 0x209   : > { %v1697_v14 = vadd.f32 %v1696_v9, %v1695_v11  ;;  %v1694_v50 = vmax.f32 %v1690_v10, 0.0 }
 0x20a   : > { %v1693_v30 = vmax.f32 %v1689_v31, 0.0 }
 0x20b   : > { %v1701_v7 = vsel %vm1700_vm3, %v1694_v50, 0.0 }
 0x20c   : > { %v1698_v17 = vsel %vm903_vm0, %v1693_v30, 0.0 }
 0x20d   : > { %v1699_v18 = vadd.f32 %v1698_v17, %v1697_v14 }
 0x20f   : > { %v1702_v1 = vadd.f32 %v1701_v7, %v1699_v18 }
 0x211   : > { %v1703_v19 = vrot.slane %v1702_v1, 4 }
 0x213   : > { %v1704_v20 = vadd.f32 %v1703_v19, %v1702_v1 }
 0x215   : > { %v1705_v2 = vrot.slane %v1704_v20, 2 }
 0x217   : > { %v1706_v13 = vadd.f32 %v1705_v2, %v1704_v20 }
 0x219   : > { %v1707_v5 = vrot.slane %v1706_v13, 1 }
 0x21b   : > { %v1708_v24 = vadd.f32 %v1707_v5, %v1706_v13 }
 0x21d   : > { %v1709_v42 = vmul.f32 0.035714287, %v1708_v24 }
 0x21f   : > { %2152 = vmatmul.mubr.msk.f32.vlgmr.msra.gmra.mrb[4].mxu1 %vm903_vm0, %v1709_v42 }
 0x220   : > { %2167 = vmatpush3.bf16.msra.mxu1 %v2166_v36  ;;  %2162 = vmatprep.mubr.msk.f32.mxu1 %vm2306_vm2, %v2305_v48 }
 0x221   : > { %2168 = vmatprep.subr.bf16.mxu1 %v2307_v53 }
 0x224   : > { %2170 = vmatpush3.bf16.msra.mxu1 %v2169_v59 }
 0x2f2   : > { %v1781_v27 = vpop.f32.mrb[4].mxu1 }
 0x2f3   : > { %v1782_v0 = vadd.f32 %v1781_v27, %v1711_v60  ;;  %v2153_v39 = vpop.f32.mrb[5].mxu1 }
 0x2f5   : > { %v1785_v40 = vmax.f32 %v1782_v0, 0.0 }
 0x2f7   : > { %2163 = vmatmul.mubr.msk.f32.vlgmr.msra.gmra.mrb[6].mxu1 %vm1791_vm4, %v1785_v40 }
 0x3ca   : > { %v1861_v28 = vpop.f32.mrb[6].mxu1 }
 0x3cb   : > { %v1862_v29 = vadd.f32 %v1861_v28, %v1790_v52  ;;  %v2164_v35 = vpop.f32.mrb[7].mxu1 }
 0x3cd   : > { %1866 = vst.msk [vmem:[%s324_s26] sm:$0x1] %vm1865_vm5, %v1862_v29 }
 0x3ce   : > { %2253 = shalt.err (!%p2250_p3)
}
 0x3cf   : > { %s2254_s22 = scalar_lea.hbm %s2727_s14, 16  ;;  %s2258_s26 = scalar_lea.hbm %s2778_s9, 32 }
 0x3d0   : > { %p2255_p4 = scmp.ne.s32.totalorder %s2727_s14, %s2254_s22  ;;  %p2259_p9 = scmp.lt.u32.totalorder %s2727_s14, %s2778_s9 }
 0x3d1   : > { %p2260_p10 = scmp.lt.u32.totalorder %s2258_s26, %s2254_s22  ;;  %p2262_p12 = scmp.lt.u32.totalorder %s2254_s22, %s2727_s14 }
 0x3d2   : > { %p2256_p7 = pnand %p2255_p4, %p2397_p5 }
 0x3d3   : > { %p2261_p11 = por %p2260_p10, %p2259_p9 }
 0x3d4   : > { %p2257_p8 = pneg %p2256_p7 }
 0x3d5   : > { %p2263_p13 = por %p2262_p12, %p2261_p11 }
 0x3d7   : > { %p2264_p0 = pnand %p2263_p13, %p2257_p8 }
 0x3d9   : > { %2267 = shalt.err (!%p2264_p0)
}
 0x3da   : > { %2195 = dma.vmem_to_hbm [thread:$0]  (%p2397_p5), %s2729_s27, 16, %s2727_s14, %s1868_s16  }
 0x3db PF: > { %p2201_p1 = scmp.ge.s32.totalorder %s2302_s12, 2  ;;  %s1892_s17 = sand.u32 1, %s2290_s30  }
 0x3dc   : > { %s1893_s13 = scalar_lea.sflag [#allocation4], %s1892_s17 }
 0x3dd   : > { %p2198_p2 = pnand %p2201_p1, %p2401_p6 }
 0x3df   : > { %2285 = dma.done.wait (!%p2198_p2), %s1893_s13, 16  }
 0x3e0   : > { %2287 = vsyncadd (!%p2198_p2), %s1893_s13, 4294967280  ;;  %p19_p3 = scmp.ge.s32.totalorder %s2384_s15, 4   ;;  %s2781_s30 = smov %s2294_s10 }
 0x3e1   : > { %s2782_s10 = smov %s2298_s11  ;;  %s2783_s11 = smov %s2395_s18 }
 0x3e2   : > { %s2784_s12 = smov %s2384_s15  ;;  %21 = sbr.rel (!%p19_p3) target bundleno = 3 (0x3), region = 185 }
 0x3e9   :  { %1897 = vsyncpa [#allocation4], 1 }
 0x3ea   :  { %1899 = vsyncpa [#allocation4 + $0x1], 1 }

</bundles_post_ra>
